<compile_context>
chip_gen: v7x
topology: tpu7x:2x2x1
jax: 0.10.0
libtpu: 0.0.40
codegen_flags: <defaults>
</compile_context>

<pallas_src>
import jax
import jax.numpy as jnp
from jax.experimental import pallas as pl
from jax.experimental.pallas import tpu as pltpu


def _linear_sigmoid_kernel(x_ref, w_ref, b_ref, o_ref):
    # x_ref: (2, TB) f32 VMEM (feature-major, lane-dense)
    # w_ref: (1, 2)  f32 SMEM (PyTorch [out, in] layout, read as scalars)
    # b_ref: (1,)    f32 SMEM
    # o_ref: (1, TB) f32 VMEM
    w0 = w_ref[0, 0]
    w1 = w_ref[0, 1]
    b = b_ref[0]
    # VPU elementwise contraction (K=2, N=1): no MXU involved.
    z = x_ref[0:1, :] * w0 + x_ref[1:2, :] * w1 + b
    # sigmoid: exp + reciprocal both issue on the EUP slot.
    o_ref[...] = pl.reciprocal(1.0 + jnp.exp(-z), approx=False)


def nnet1l_forward(x, weight, bias, *, tb=512):
    """Forward pass of NNet1L: sigmoid(x @ W^T + b).

    x:      (B, 2)  any float dtype (cast to f32, matching `x.float()`)
    weight: (1, 2)  PyTorch layout [out_features, in_features]
    bias:   (1,)
    returns (B, 1) float32
    """
    B = x.shape[0]
    x_fm = x.astype(jnp.float32).T          # (2, B) feature-major, lane-dense
    w = weight.astype(jnp.float32)          # (1, 2), consumed as scalars in SMEM
    b = bias.astype(jnp.float32)            # (1,)

    if B <= tb:
        block_b = B
        b_pad = B
    else:
        b_pad = pl.cdiv(B, tb) * tb
        block_b = tb
        if b_pad != B:
            x_fm = jnp.pad(x_fm, ((0, 0), (0, b_pad - B)))

    out = pl.pallas_call(
        _linear_sigmoid_kernel,
        out_shape=jax.ShapeDtypeStruct((1, b_pad), jnp.float32),
        grid=(b_pad // block_b,),
        in_specs=[
            pl.BlockSpec((2, block_b), lambda i: (0, i)),            # x tile (VMEM)
            pl.BlockSpec(memory_space=pltpu.MemorySpace.SMEM),       # weight (SMEM)
            pl.BlockSpec(memory_space=pltpu.MemorySpace.SMEM),       # bias   (SMEM)
        ],
        out_specs=pl.BlockSpec((1, block_b), lambda i: (0, i)),
        compiler_params=pltpu.CompilerParams(
            dimension_semantics=("parallel",)),
    )(x_fm, w, b)

    return out[:, :B].T                     # back to PyTorch-style (B, 1)


def nnet1l_reference(x, weight, bias):
    xf = x.astype(jnp.float32)
    z = xf @ weight.astype(jnp.float32).T + bias.astype(jnp.float32)
    return jax.nn.sigmoid(z)


if __name__ == "__main__":
    key = jax.random.PRNGKey(0)
    k_x, k_w, k_b, k_x2 = jax.random.split(key, 4)

    # nn.Linear(2, 1)-shaped parameters, PyTorch default-init-like bounds.
    bound = 1.0 / jnp.sqrt(2.0)
    weight = jax.random.uniform(k_w, (1, 2), minval=-bound, maxval=bound,
                                dtype=jnp.float32)
    bias = jax.random.uniform(k_b, (1,), minval=-bound, maxval=bound,
                              dtype=jnp.float32)

    # Small XOR-like batch: 8 examples, 2 features each (single-block path).
    B = 8
    x = jax.random.uniform(k_x, (B, 2), dtype=jnp.float32)
    out = jax.block_until_ready(nnet1l_forward(x, weight, bias))
    ref = nnet1l_reference(x, weight, bias)
    assert out.shape == (B, 1)
    assert jnp.allclose(out, ref, atol=1e-5, rtol=1e-5), "mismatch (small batch)"

    # Larger batch exercising the tiled + padded path (3 tiles of 512).
    B2 = 1027
    x2 = jax.random.uniform(k_x2, (B2, 2), dtype=jnp.float32)
    out2 = jax.block_until_ready(nnet1l_forward(x2, weight, bias))
    ref2 = nnet1l_reference(x2, weight, bias)
    assert out2.shape == (B2, 1)
    assert jnp.allclose(out2, ref2, atol=1e-5, rtol=1e-5), "mismatch (tiled batch)"

    print("KERNEL_OK")
</pallas_src>

<mosaic_0001>
module attributes {stable_mosaic.version = 11 : i64} {
  func.func @_linear_sigmoid_kernel(%arg0: i32, %arg1: memref<2x8xf32, #tpu.memory_space<vmem>>, %arg2: memref<1x2xf32, #tpu.memory_space<smem>>, %arg3: memref<1xf32, #tpu.memory_space<smem>>, %arg4: memref<1x8xf32, #tpu.memory_space<vmem>>) attributes {dimension_semantics = [#tpu.dimension_semantics<parallel>], iteration_bounds = array<i64: 1>, scalar_prefetch = 0 : i64, scratch_operands = 0 : i64, tpu.core_type = #tpu.core_type<tc>, window_params = [{transform_indices = @transform_0, window_bounds = array<i64: 2, 8>}, {transform_indices = @transform_1, window_bounds = array<i64: 1, 2>}, {transform_indices = @transform_2, window_bounds = array<i64: 1>}, {transform_indices = @transform_3, window_bounds = array<i64: 1, 8>}]} {
    %c0 = arith.constant 0 : index
    %c0_0 = arith.constant 0 : index
    %0 = memref.load %arg2[%c0, %c0_0] : memref<1x2xf32, #tpu.memory_space<smem>>
    %c0_1 = arith.constant 0 : index
    %c1 = arith.constant 1 : index
    %1 = memref.load %arg2[%c0_1, %c1] : memref<1x2xf32, #tpu.memory_space<smem>>
    %c0_2 = arith.constant 0 : index
    %2 = memref.load %arg3[%c0_2] : memref<1xf32, #tpu.memory_space<smem>>
    %c0_3 = arith.constant 0 : index
    %c0_4 = arith.constant 0 : index
    %3 = vector.load %arg1[%c0_3, %c0_4] : memref<2x8xf32, #tpu.memory_space<vmem>>, vector<1x8xf32>
    %4 = vector.broadcast %0 : f32 to vector<1x8xf32>
    %5 = arith.mulf %3, %4 : vector<1x8xf32>
    %c1_5 = arith.constant 1 : index
    %c0_6 = arith.constant 0 : index
    %6 = vector.load %arg1[%c1_5, %c0_6] : memref<2x8xf32, #tpu.memory_space<vmem>>, vector<1x8xf32>
    %7 = vector.broadcast %1 : f32 to vector<1x8xf32>
    %8 = arith.mulf %6, %7 : vector<1x8xf32>
    %9 = arith.addf %5, %8 : vector<1x8xf32>
    %10 = vector.broadcast %2 : f32 to vector<1x8xf32>
    %11 = arith.addf %9, %10 : vector<1x8xf32>
    %cst = arith.constant 0.000000e+00 : f32
    %12 = vector.broadcast %cst : f32 to vector<1x8xf32>
    %13 = arith.subf %12, %11 : vector<1x8xf32>
    %14 = math.exp %13 : vector<1x8xf32>
    %cst_7 = arith.constant 1.000000e+00 : f32
    %15 = vector.broadcast %cst_7 : f32 to vector<1x8xf32>
    %16 = arith.addf %15, %14 : vector<1x8xf32>
    %17 = tpu.reciprocal %16 : vector<1x8xf32> -> vector<1x8xf32>
    %c0_8 = arith.constant 0 : index
    %c0_9 = arith.constant 0 : index
    %18 = vector.load %arg4[%c0_8, %c0_9] : memref<1x8xf32, #tpu.memory_space<vmem>>, vector<1x8xf32>
    tpu.vector_store %arg4[%c0_8, %c0_9], %17 {strides = array<i32>} : memref<1x8xf32, #tpu.memory_space<vmem>>, vector<1x8xf32>,
    return
  }
  func.func @transform_0(%arg0: i32) -> (i32, i32) {
    %c0_i32 = arith.constant 0 : i32
    %c0_i32_0 = arith.constant 0 : i32
    return %c0_i32, %arg0 : i32, i32
  }
  func.func @transform_1(%arg0: i32) -> (i32, i32) {
    %c0_i32 = arith.constant 0 : i32
    %c0_i32_0 = arith.constant 0 : i32
    %c0_i32_1 = arith.constant 0 : i32
    return %c0_i32, %c0_i32_0 : i32, i32
  }
  func.func @transform_2(%arg0: i32) -> i32 {
    %c0_i32 = arith.constant 0 : i32
    %c0_i32_0 = arith.constant 0 : i32
    return %c0_i32 : i32
  }
  func.func @transform_3(%arg0: i32) -> (i32, i32) {
    %c0_i32 = arith.constant 0 : i32
    %c0_i32_0 = arith.constant 0 : i32
    return %c0_i32, %arg0 : i32, i32
  }
}

</mosaic_0001>

<bundles_post_ra>
// kernel: tpu_custom_call.1
= control target key start
LH: loop header
LB: loop body
LE: loop exit
PB: predicated region body
PF: predicated region fallthrough
CT: control target
= control target key end

     0   :  { %9 = vsyncpa [#allocation5], 0  ;;  %s154_s0 = inlined_call_operand.vmem [shape: f32[2,8], index: 0, kind: input, shape index: {}]   ;;  %s155_s1 = inlined_call_operand.vmem [shape: f32[1,2], index: 1, kind: input, shape index: {}]   ;;  %s156_s2 = inlined_call_operand.<no memory space> [shape: f32[1], index: 2, kind: input, shape index: {}]   ;;  %s157_s3 = inlined_call_operand.hbm [shape: f32[1,8], index: 3, kind: output, shape index: {}]  }
   0x1   :  { %10 = vsyncpa [#allocation4], 0  ;;  %s19_s14 = sshll.u32 %s155_s1, 4  ;;  %s20_s14 = int_to_ptr.vmem [resolvable:$true] %s19_s14 }
   0x2   :  { %s70_s15 = scalar_lea.vmem %s20_s14, 16  ;;  %p75_p1 = scmp.lt.s32.totalorder %s20_s14, %s20_s14 }
   0x3   :  { %p71_p0 = scmp.ne.s32.totalorder %s20_s14, %s70_s15  ;;  %p76_p2 = scmp.lt.s32.totalorder %s70_s15, %s70_s15 }
   0x5   :  { %p77_p3 = por %p76_p2, %p75_p1 }
   0x7   :  { %p78_p4 = pnand %p77_p3, %p71_p0 }
   0x9   :  { %81 = shalt.err (!%p78_p4)
}
   0xa   :  { %s108_s16 = smov [#allocation3]  }
   0xb   :  { %22 = dma.vmem_to_smem %s20_s14, 16, %s108_s16, [#allocation5]  }
   0xc   :  { %104 = dma.done.wait [#allocation5], 16  }
   0xd   :  { %105 = vsyncadd [#allocation5], 4294967280 }
   0xe   :  { %28 = sfence }
   0xf   :  { %s29_s17 = sld [smem:[#allocation3]]  ;;  %s63_s18 = sld [smem:[#allocation3 + $0x1]]  ;;  %v32_v0 = vld [vmem:[%s154_s0] sm:$0x1]  ;;  %v35_v1 = vld [vmem:[%s154_s0 + $0x1] sm:$0x1]  ;;  %v39_v6 = vstv %s156_s2 }
  0x10   :  { %s109_s24 = smov [#allocation6]   ;;  %vm46_vm0 = vcmask 57344  }
  0x11   :  { %s54_s25 = sshll.u32 %s109_s24, 4  ;;  %s55_s25 = int_to_ptr.vmem [resolvable:$true] %s54_s25 }
  0x12   :  { %s82_s0 = scalar_lea.vmem %s55_s25, 16  ;;  %s86_s26 = scalar_lea.vmem %s55_s25, 32 }
  0x13   :  { %p83_p5 = scmp.ne.s32.totalorder %s55_s25, %s82_s0  ;;  %p87_p6 = scmp.lt.s32.totalorder %s55_s25, %s55_s25 }
  0x14   :  { %p88_p7 = scmp.lt.s32.totalorder %s86_s26, %s82_s0 }
  0x15   :  { %v33_v2 = vstv %s29_s17  ;;  %v36_v3 = vstv %s63_s18 }
  0x16   :  { %v34_v4 = vmul.f32 %v33_v2, %v32_v0  ;;  %v37_v5 = vmul.f32 %v36_v3, %v35_v1  ;;  %p89_p8 = por %p88_p7, %p87_p6 }
  0x18   :  { %v38_v7 = vadd.f32 %v37_v5, %v34_v4  ;;  %p90_p9 = pnand %p89_p8, %p83_p5 }
  0x1a   :  { %v40_v8 = vadd.f32 %v39_v6, %v38_v7 }
  0x1c   :  { %v41_v9 = vsub.f32 0.0, %v40_v8 }
  0x1e   :  { %v42_v10 = vmul.f32 1.442695, %v41_v9 }
  0x20   :  { %66 = vpow2.f32 %v42_v10 }
  0x2a   :  { %v67_v11 = vpop.eup %66 }
  0x2b   :  { %v44_v12 = vadd.f32 1.0, %v67_v11 }
  0x2d   :  { %68 = vrcp.f32 %v44_v12 }
  0x37   :  { %v69_v13 = vpop.eup %68 }
  0x38   :  { %47 = vst.msk [vmem:[#allocation6] sm:$0x1] %vm46_vm0, %v69_v13 }
  0x39   :  { %93 = shalt.err (!%p90_p9)
}
  0x3a   :  { %s94_s28 = scalar_lea.hbm %s157_s3, 16 }
  0x3b   :  { %p95_p10 = scmp.ne.s32.totalorder %s157_s3, %s94_s28  ;;  %p98_p11 = scmp.lt.u32.totalorder %s94_s28, %s157_s3 }
  0x3d   :  { %p100_p12 = pnand %p98_p11, %p95_p10 }
  0x3f   :  { %103 = shalt.err (!%p100_p12)
}
  0x40   :  { %57 = dma.vmem_to_hbm [thread:$0]  %s55_s25, 16, %s157_s3, [#allocation4]  }
  0x41   :  { %106 = dma.done.wait [#allocation4], 16  }
  0x42   :  { %107 = vsyncadd [#allocation4], 4294967280 }
  0x43   :  { %61 = vsyncpa [#allocation4], 1 }
  0x44   :  { %62 = vsyncpa [#allocation5], 1 }

</bundles_post_ra>
